<compile_context>
chip_gen: v7x
topology: tpu7x:2x2x1
jax: 0.10.0
libtpu: 0.0.40
codegen_flags: <defaults>
</compile_context>

<pallas_src>
import functools

import jax
import jax.numpy as jnp
from jax.experimental import pallas as pl
from jax.experimental.pallas import tpu as pltpu


LANE = 128  # TODO(synk): on v6e a 256-wide N tile would fill the 2x256 MXU; 128 kept for v5e/v7x portability.


def _round_up(x, m):
    return ((x + m - 1) // m) * m


def card_rnn_kernel(x_ref, w1_ref, b1_ref, w3_ref, b3_ref, w2_ref, b2_ref,
                    *rest, hidden_real: float, use_layer_norm: bool):
    if use_layer_norm:
        g_ref, beta_ref, q_ref = rest
    else:
        (q_ref,) = rest

    # fc1 + ReLU  (bf16 MXU inputs, f32 accumulate, f32 elementwise)
    x = x_ref[...].astype(jnp.bfloat16)
    h1 = jnp.dot(x, w1_ref[...], preferred_element_type=jnp.float32) + b1_ref[...]
    h1 = jnp.maximum(h1, 0.0)

    # fc3 + ReLU
    h2 = jnp.dot(h1.astype(jnp.bfloat16), w3_ref[...],
                 preferred_element_type=jnp.float32) + b3_ref[...]
    h2 = jnp.maximum(h2, 0.0)

    if use_layer_norm:
        # Single-pass LayerNorm over the real hidden columns.
        # Padded hidden columns of h2 are exactly 0 (zero weights/biases), so
        # summing over the padded axis and dividing by hidden_real is exact.
        inv_h = 1.0 / hidden_real
        mean = jnp.sum(h2, axis=-1, keepdims=True) * inv_h
        ex2 = jnp.sum(h2 * h2, axis=-1, keepdims=True) * inv_h
        var = ex2 - mean * mean
        h2 = (h2 - mean) * jax.lax.rsqrt(var + 1e-5)
        # Padded gamma/beta are 0, so padded columns stay 0.
        h2 = h2 * g_ref[...] + beta_ref[...]

    # fc2 (padded hidden rows of w2 are 0, padded action cols sliced off outside)
    q_ref[...] = (jnp.dot(h2.astype(jnp.bfloat16), w2_ref[...],
                          preferred_element_type=jnp.float32) + b2_ref[...])


def card_rnn_agent_forward(inputs, pparams, *, use_layer_norm: bool,
                           batch_tile: int = 512):
    """inputs: (b, e) f32 with e = input_shape + 54. Returns q: (b, n_actions) f32."""
    b, e = inputs.shape
    in_pad, h_pad = pparams["w1"].shape
    a_pad = pparams["w2"].shape[1]
    hidden = pparams["hidden"]
    n_actions = pparams["n_actions"]

    bt = min(batch_tile, _round_up(b, 8))
    b_pad = _round_up(b, bt)

    x = inputs.astype(jnp.float32)
    if (b_pad, in_pad) != (b, e):
        x = jnp.pad(x, ((0, b_pad - b), (0, in_pad - e)))

    def tiled(shape):      # batch-tiled operand
        return pl.BlockSpec(shape, lambda i: (i, 0))

    def resident(shape):   # VMEM-resident across all grid steps
        return pl.BlockSpec(shape, lambda i: (0, 0))

    in_specs = [
        tiled((bt, in_pad)),
        resident((in_pad, h_pad)), resident((1, h_pad)),
        resident((h_pad, h_pad)), resident((1, h_pad)),
        resident((h_pad, a_pad)), resident((1, a_pad)),
    ]
    args = [x, pparams["w1"], pparams["b1"], pparams["w3"], pparams["b3"],
            pparams["w2"], pparams["b2"]]
    if use_layer_norm:
        in_specs += [resident((1, h_pad)), resident((1, h_pad))]
        args += [pparams["gamma"], pparams["beta"]]

    flops = 2 * b_pad * (in_pad * h_pad + h_pad * h_pad + h_pad * a_pad)
    transcendentals = b_pad if use_layer_norm else 0
    bytes_accessed = (
        4 * b_pad * in_pad                                        # inputs (f32)
        + 2 * (in_pad * h_pad + h_pad * h_pad + h_pad * a_pad)    # bf16 weights
        + 4 * (2 * h_pad + a_pad + (2 * h_pad if use_layer_norm else 0))  # f32 biases/LN
        + 4 * b_pad * a_pad                                       # output (f32)
    )

    kernel = functools.partial(card_rnn_kernel,
                               hidden_real=float(hidden),
                               use_layer_norm=use_layer_norm)

    q_padded = pl.pallas_call(
        kernel,
        out_shape=jax.ShapeDtypeStruct((b_pad, a_pad), jnp.float32),
        grid=(b_pad // bt,),
        in_specs=in_specs,
        out_specs=tiled((bt, a_pad)),
        compiler_params=pltpu.CompilerParams(
            dimension_semantics=("parallel",)),
        cost_estimate=pl.CostEstimate(flops=flops,
                                      transcendentals=transcendentals,
                                      bytes_accessed=bytes_accessed),
    )(*args)

    return q_padded[:b, :n_actions]


def init_params(key, in_dim, hidden, n_actions):
    """Logical (unpadded, f32) params; weights stored as (in, out)."""
    ks = jax.random.split(key, 6)
    scale = 0.1
    return {
        "w1": scale * jax.random.normal(ks[0], (in_dim, hidden), jnp.float32),
        "b1": scale * jax.random.normal(ks[1], (hidden,), jnp.float32),
        "w3": scale * jax.random.normal(ks[2], (hidden, hidden), jnp.float32),
        "b3": scale * jax.random.normal(ks[3], (hidden,), jnp.float32),
        "w2": scale * jax.random.normal(ks[4], (hidden, n_actions), jnp.float32),
        "b2": scale * jax.random.normal(ks[5], (n_actions,), jnp.float32),
        # LayerNorm params (identity-initialized, as torch.nn.LayerNorm does)
        "gamma": jnp.ones((hidden,), jnp.float32),
        "beta": jnp.zeros((hidden,), jnp.float32),
    }


def prepare_params(params, in_dim, hidden, n_actions, lane=LANE):
    """Pad feature dims to lane multiples; weights -> bf16, vectors -> (1, pad) f32."""
    in_pad = _round_up(in_dim, lane)
    h_pad = _round_up(hidden, lane)
    a_pad = _round_up(n_actions, lane)

    def pad_mat(w, rows, cols, dtype):
        return jnp.pad(w, ((0, rows - w.shape[0]), (0, cols - w.shape[1]))).astype(dtype)

    def pad_vec(v, cols, dtype):
        return jnp.pad(v.reshape(1, -1), ((0, 0), (0, cols - v.shape[0]))).astype(dtype)

    return {
        "w1": pad_mat(params["w1"], in_pad, h_pad, jnp.bfloat16),
        "b1": pad_vec(params["b1"], h_pad, jnp.float32),
        "w3": pad_mat(params["w3"], h_pad, h_pad, jnp.bfloat16),
        "b3": pad_vec(params["b3"], h_pad, jnp.float32),
        "w2": pad_mat(params["w2"], h_pad, a_pad, jnp.bfloat16),  # padded rows = 0
        "b2": pad_vec(params["b2"], a_pad, jnp.float32),
        "gamma": pad_vec(params["gamma"], h_pad, jnp.float32),     # padded cols = 0
        "beta": pad_vec(params["beta"], h_pad, jnp.float32),       # padded cols = 0
        "hidden": hidden,
        "n_actions": n_actions,
    }


def reference_forward(inputs, params, *, use_layer_norm: bool):
    """Same math as the kernel (bf16 matmul inputs, f32 accumulation)."""
    def mm(a, w):
        return jnp.dot(a.astype(jnp.bfloat16), w.astype(jnp.bfloat16),
                       preferred_element_type=jnp.float32)

    h1 = jax.nn.relu(mm(inputs, params["w1"]) + params["b1"])
    h2 = jax.nn.relu(mm(h1, params["w3"]) + params["b3"])
    if use_layer_norm:
        mean = jnp.mean(h2, axis=-1, keepdims=True)
        var = jnp.mean((h2 - mean) ** 2, axis=-1, keepdims=True)
        h2 = (h2 - mean) * jax.lax.rsqrt(var + 1e-5)
        h2 = h2 * params["gamma"] + params["beta"]
    return mm(h2, params["w2"]) + params["b2"]


if __name__ == "__main__":
    # Shapes consistent with the module:
    #   input_shape = 10  ->  fc1 input dim = input_shape + 54 = 64
    #   rnn_hidden_dim = 32, n_actions = 16, batch = 8
    input_shape = 10
    in_dim = input_shape + 54
    hidden = 32
    n_actions = 16
    batch = 8

    key = jax.random.PRNGKey(0)
    k_in, k_params = jax.random.split(key)

    inputs = jax.random.normal(k_in, (batch, in_dim), jnp.float32)
    params = init_params(k_params, in_dim, hidden, n_actions)
    pparams = prepare_params(params, in_dim, hidden, n_actions)

    # LayerNorm path
    q = card_rnn_agent_forward(inputs, pparams, use_layer_norm=True)
    q = jax.block_until_ready(q)
    q_ref = reference_forward(inputs, params, use_layer_norm=True)
    assert q.shape == (batch, n_actions)
    assert jnp.allclose(q, q_ref, atol=2e-3, rtol=2e-3), (
        "layernorm path mismatch, max abs err = %g"
        % float(jnp.max(jnp.abs(q - q_ref))))

    # No-LayerNorm path
    q2 = jax.block_until_ready(
        card_rnn_agent_forward(inputs, pparams, use_layer_norm=False))
    q2_ref = reference_forward(inputs, params, use_layer_norm=False)
    assert jnp.allclose(q2, q2_ref, atol=2e-3, rtol=2e-3), (
        "plain path mismatch, max abs err = %g"
        % float(jnp.max(jnp.abs(q2 - q2_ref))))

    print("KERNEL_OK")
</pallas_src>

<mosaic_0001>
module attributes {stable_mosaic.version = 11 : i64} {
  func.func @card_rnn_kernel(%arg0: i32, %arg1: memref<8x128xf32, #tpu.memory_space<vmem>>, %arg2: memref<128x128xbf16, #tpu.memory_space<vmem>>, %arg3: memref<1x128xf32, #tpu.memory_space<vmem>>, %arg4: memref<128x128xbf16, #tpu.memory_space<vmem>>, %arg5: memref<1x128xf32, #tpu.memory_space<vmem>>, %arg6: memref<128x128xbf16, #tpu.memory_space<vmem>>, %arg7: memref<1x128xf32, #tpu.memory_space<vmem>>, %arg8: memref<1x128xf32, #tpu.memory_space<vmem>>, %arg9: memref<1x128xf32, #tpu.memory_space<vmem>>, %arg10: memref<8x128xf32, #tpu.memory_space<vmem>>) attributes {dimension_semantics = [#tpu.dimension_semantics<parallel>], iteration_bounds = array<i64: 1>, scalar_prefetch = 0 : i64, scratch_operands = 0 : i64, tpu.core_type = #tpu.core_type<tc>, window_params = [{transform_indices = @transform_0, window_bounds = array<i64: 8, 128>}, {pipeline_mode = #tpu.pipeline_mode<synchronous>, transform_indices = @transform_1, window_bounds = array<i64: 128, 128>}, {pipeline_mode = #tpu.pipeline_mode<synchronous>, transform_indices = @transform_2, window_bounds = array<i64: 1, 128>}, {pipeline_mode = #tpu.pipeline_mode<synchronous>, transform_indices = @transform_3, window_bounds = array<i64: 128, 128>}, {pipeline_mode = #tpu.pipeline_mode<synchronous>, transform_indices = @transform_4, window_bounds = array<i64: 1, 128>}, {pipeline_mode = #tpu.pipeline_mode<synchronous>, transform_indices = @transform_5, window_bounds = array<i64: 128, 128>}, {pipeline_mode = #tpu.pipeline_mode<synchronous>, transform_indices = @transform_6, window_bounds = array<i64: 1, 128>}, {pipeline_mode = #tpu.pipeline_mode<synchronous>, transform_indices = @transform_7, window_bounds = array<i64: 1, 128>}, {pipeline_mode = #tpu.pipeline_mode<synchronous>, transform_indices = @transform_8, window_bounds = array<i64: 1, 128>}, {transform_indices = @transform_9, window_bounds = array<i64: 8, 128>}]} {
    %c0 = arith.constant 0 : index
    %c0_0 = arith.constant 0 : index
    %0 = vector.load %arg1[%c0, %c0_0] : memref<8x128xf32, #tpu.memory_space<vmem>>, vector<8x128xf32>
    %1 = arith.truncf %0 : vector<8x128xf32> to vector<8x128xbf16>
    %c0_1 = arith.constant 0 : index
    %c0_2 = arith.constant 0 : index
    %2 = vector.load %arg2[%c0_1, %c0_2] : memref<128x128xbf16, #tpu.memory_space<vmem>>, vector<128x128xbf16>
    %cst = arith.constant dense<0.000000e+00> : vector<8x128xf32>
    %3 = tpu.matmul %1, %2, %cst {dimension_numbers = #tpu.dot_dimension_numbers<[1], [0], [0], [1], [0, 0, 1, 1], [], []>} : vector<8x128xbf16>, vector<128x128xbf16>, vector<8x128xf32> -> vector<8x128xf32>
    %c0_3 = arith.constant 0 : index
    %c0_4 = arith.constant 0 : index
    %4 = vector.load %arg3[%c0_3, %c0_4] : memref<1x128xf32, #tpu.memory_space<vmem>>, vector<1x128xf32>
    %5 = vector.broadcast %4 : vector<1x128xf32> to vector<8x128xf32>
    %6 = arith.addf %3, %5 : vector<8x128xf32>
    %cst_5 = arith.constant 0.000000e+00 : f32
    %7 = vector.broadcast %cst_5 : f32 to vector<8x128xf32>
    %8 = arith.maximumf %6, %7 : vector<8x128xf32>
    %9 = arith.truncf %8 : vector<8x128xf32> to vector<8x128xbf16>
    %c0_6 = arith.constant 0 : index
    %c0_7 = arith.constant 0 : index
    %10 = vector.load %arg4[%c0_6, %c0_7] : memref<128x128xbf16, #tpu.memory_space<vmem>>, vector<128x128xbf16>
    %cst_8 = arith.constant dense<0.000000e+00> : vector<8x128xf32>
    %11 = tpu.matmul %9, %10, %cst_8 {dimension_numbers = #tpu.dot_dimension_numbers<[1], [0], [0], [1], [0, 0, 1, 1], [], []>} : vector<8x128xbf16>, vector<128x128xbf16>, vector<8x128xf32> -> vector<8x128xf32>
    %c0_9 = arith.constant 0 : index
    %c0_10 = arith.constant 0 : index
    %12 = vector.load %arg5[%c0_9, %c0_10] : memref<1x128xf32, #tpu.memory_space<vmem>>, vector<1x128xf32>
    %13 = vector.broadcast %12 : vector<1x128xf32> to vector<8x128xf32>
    %14 = arith.addf %11, %13 : vector<8x128xf32>
    %cst_11 = arith.constant 0.000000e+00 : f32
    %15 = vector.broadcast %cst_11 : f32 to vector<8x128xf32>
    %16 = arith.maximumf %14, %15 : vector<8x128xf32>
    %cst_12 = arith.constant dense<0.000000e+00> : vector<8xf32>
    %17 = vector.multi_reduction <add>, %16, %cst_12 [1] : vector<8x128xf32> to vector<8xf32>
    %18 = vector.shape_cast %17 : vector<8xf32> to vector<8x1xf32>
    %cst_13 = arith.constant 3.125000e-02 : f32
    %19 = vector.broadcast %cst_13 : f32 to vector<8x1xf32>
    %20 = arith.mulf %18, %19 : vector<8x1xf32>
    %21 = arith.mulf %16, %16 : vector<8x128xf32>
    %cst_14 = arith.constant dense<0.000000e+00> : vector<8xf32>
    %22 = vector.multi_reduction <add>, %21, %cst_14 [1] : vector<8x128xf32> to vector<8xf32>
    %23 = vector.shape_cast %22 : vector<8xf32> to vector<8x1xf32>
    %cst_15 = arith.constant 3.125000e-02 : f32
    %24 = vector.broadcast %cst_15 : f32 to vector<8x1xf32>
    %25 = arith.mulf %23, %24 : vector<8x1xf32>
    %26 = arith.mulf %20, %20 : vector<8x1xf32>
    %27 = arith.subf %25, %26 : vector<8x1xf32>
    %28 = vector.broadcast %20 : vector<8x1xf32> to vector<8x128xf32>
    %29 = arith.subf %16, %28 : vector<8x128xf32>
    %cst_16 = arith.constant 9.99999974E-6 : f32
    %30 = vector.broadcast %cst_16 : f32 to vector<8x1xf32>
    %31 = arith.addf %27, %30 : vector<8x1xf32>
    %32 = math.rsqrt %31 : vector<8x1xf32>
    %33 = vector.broadcast %32 : vector<8x1xf32> to vector<8x128xf32>
    %34 = arith.mulf %29, %33 : vector<8x128xf32>
    %c0_17 = arith.constant 0 : index
    %c0_18 = arith.constant 0 : index
    %35 = vector.load %arg8[%c0_17, %c0_18] : memref<1x128xf32, #tpu.memory_space<vmem>>, vector<1x128xf32>
    %36 = vector.broadcast %35 : vector<1x128xf32> to vector<8x128xf32>
    %37 = arith.mulf %34, %36 : vector<8x128xf32>
    %c0_19 = arith.constant 0 : index
    %c0_20 = arith.constant 0 : index
    %38 = vector.load %arg9[%c0_19, %c0_20] : memref<1x128xf32, #tpu.memory_space<vmem>>, vector<1x128xf32>
    %39 = vector.broadcast %38 : vector<1x128xf32> to vector<8x128xf32>
    %40 = arith.addf %37, %39 : vector<8x128xf32>
    %41 = arith.truncf %40 : vector<8x128xf32> to vector<8x128xbf16>
    %c0_21 = arith.constant 0 : index
    %c0_22 = arith.constant 0 : index
    %42 = vector.load %arg6[%c0_21, %c0_22] : memref<128x128xbf16, #tpu.memory_space<vmem>>, vector<128x128xbf16>
    %cst_23 = arith.constant dense<0.000000e+00> : vector<8x128xf32>
    %43 = tpu.matmul %41, %42, %cst_23 {dimension_numbers = #tpu.dot_dimension_numbers<[1], [0], [0], [1], [0, 0, 1, 1], [], []>} : vector<8x128xbf16>, vector<128x128xbf16>, vector<8x128xf32> -> vector<8x128xf32>
    %c0_24 = arith.constant 0 : index
    %c0_25 = arith.constant 0 : index
    %44 = vector.load %arg7[%c0_24, %c0_25] : memref<1x128xf32, #tpu.memory_space<vmem>>, vector<1x128xf32>
    %45 = vector.broadcast %44 : vector<1x128xf32> to vector<8x128xf32>
    %46 = arith.addf %43, %45 : vector<8x128xf32>
    %c0_26 = arith.constant 0 : index
    %c0_27 = arith.constant 0 : index
    %47 = vector.load %arg10[%c0_26, %c0_27] : memref<8x128xf32, #tpu.memory_space<vmem>>, vector<8x128xf32>
    tpu.vector_store %arg10[%c0_26, %c0_27], %46 {strides = array<i32>} : memref<8x128xf32, #tpu.memory_space<vmem>>, vector<8x128xf32>,
    return
  }
  func.func @transform_0(%arg0: i32) -> (i32, i32) {
    %c0_i32 = arith.constant 0 : i32
    %c0_i32_0 = arith.constant 0 : i32
    return %arg0, %c0_i32 : i32, i32
  }
  func.func @transform_1(%arg0: i32) -> (i32, i32) {
    %c0_i32 = arith.constant 0 : i32
    %c0_i32_0 = arith.constant 0 : i32
    %c0_i32_1 = arith.constant 0 : i32
    return %c0_i32, %c0_i32_0 : i32, i32
  }
  func.func @transform_2(%arg0: i32) -> (i32, i32) {
    %c0_i32 = arith.constant 0 : i32
    %c0_i32_0 = arith.constant 0 : i32
    %c0_i32_1 = arith.constant 0 : i32
    return %c0_i32, %c0_i32_0 : i32, i32
  }
  func.func @transform_3(%arg0: i32) -> (i32, i32) {
    %c0_i32 = arith.constant 0 : i32
    %c0_i32_0 = arith.constant 0 : i32
    %c0_i32_1 = arith.constant 0 : i32
    return %c0_i32, %c0_i32_0 : i32, i32
  }
  func.func @transform_4(%arg0: i32) -> (i32, i32) {
    %c0_i32 = arith.constant 0 : i32
    %c0_i32_0 = arith.constant 0 : i32
    %c0_i32_1 = arith.constant 0 : i32
    return %c0_i32, %c0_i32_0 : i32, i32
  }
  func.func @transform_5(%arg0: i32) -> (i32, i32) {
    %c0_i32 = arith.constant 0 : i32
    %c0_i32_0 = arith.constant 0 : i32
    %c0_i32_1 = arith.constant 0 : i32
    return %c0_i32, %c0_i32_0 : i32, i32
  }
  func.func @transform_6(%arg0: i32) -> (i32, i32) {
    %c0_i32 = arith.constant 0 : i32
    %c0_i32_0 = arith.constant 0 : i32
    %c0_i32_1 = arith.constant 0 : i32
    return %c0_i32, %c0_i32_0 : i32, i32
  }
  func.func @transform_7(%arg0: i32) -> (i32, i32) {
    %c0_i32 = arith.constant 0 : i32
    %c0_i32_0 = arith.constant 0 : i32
    %c0_i32_1 = arith.constant 0 : i32
    return %c0_i32, %c0_i32_0 : i32, i32
  }
  func.func @transform_8(%arg0: i32) -> (i32, i32) {
    %c0_i32 = arith.constant 0 : i32
    %c0_i32_0 = arith.constant 0 : i32
    %c0_i32_1 = arith.constant 0 : i32
    return %c0_i32, %c0_i32_0 : i32, i32
  }
  func.func @transform_9(%arg0: i32) -> (i32, i32) {
    %c0_i32 = arith.constant 0 : i32
    %c0_i32_0 = arith.constant 0 : i32
    return %arg0, %c0_i32 : i32, i32
  }
}

</mosaic_0001>

<bundles_post_ra>
// kernel: tpu_custom_call.1
= control target key start
LH: loop header
LB: loop body
LE: loop exit
PB: predicated region body
PF: predicated region fallthrough
CT: control target
= control target key end

     0   :  { %14 = vsyncpa [#allocation3], 0  ;;  %s915_s0 = inlined_call_operand.hbm [shape: f32[8,128], index: 0, kind: input, shape index: {}]   ;;  %s916_s1 = inlined_call_operand.hbm [shape: bf16[128,128], index: 1, kind: input, shape index: {}]   ;;  %s917_s2 = inlined_call_operand.vmem [shape: f32[1,128], index: 2, kind: input, shape index: {}]   ;;  %s918_s3 = inlined_call_operand.hbm [shape: bf16[128,128], index: 3, kind: input, shape index: {}]   ;;  %s919_s4 = inlined_call_operand.vmem [shape: f32[1,128], index: 4, kind: input, shape index: {}]   ;;  %s920_s5 = inlined_call_operand.hbm [shape: bf16[128,128], index: 5, kind: input, shape index: {}]   ;;  %s921_s6 = inlined_call_operand.vmem [shape: f32[1,128], index: 6, kind: input, shape index: {}]   ;;  %s922_s7 = inlined_call_operand.vmem [shape: f32[1,128], index: 7, kind: input, shape index: {}]   ;;  %s923_s8 = inlined_call_operand.vmem [shape: f32[1,128], index: 8, kind: input, shape index: {}]   ;;  %s924_s9 = inlined_call_operand.hbm [shape: f32[8,128], index: 9, kind: output, shape index: {}]  }
   0x1   :  { %15 = vsyncpa [#allocation6], 0 }
   0x2   :  { %16 = vsyncpa [#allocation9], 0 }
   0x3   :  { %17 = vsyncpa [#allocation4], 0  ;;  %s742_s30 = smov [#allocation5]   ;;  %s624_s13 = scalar_lea.hbm %s916_s1, 1024 }
   0x4   :  { %s33_s10 = sshll.u32 %s742_s30, 4  ;;  %p625_p0 = scmp.ne.s32.totalorder %s916_s1, %s624_s13  ;;  %s34_s10 = int_to_ptr.vmem [resolvable:$true] %s33_s10 }
   0x5   :  { %p628_p1 = scmp.lt.u32.totalorder %s624_s13, %s916_s1 }
   0x7   :  { %p630_p2 = pnand %p628_p1, %p625_p0 }
   0x9   :  { %633 = shalt.err (!%p630_p2)
}
   0xa   :  { %s634_s18 = scalar_lea.vmem %s34_s10, 1024  ;;  %p639_p4 = scmp.lt.s32.totalorder %s34_s10, %s34_s10 }
   0xb   :  { %p635_p3 = scmp.ne.s32.totalorder %s34_s10, %s634_s18  ;;  %p640_p5 = scmp.lt.s32.totalorder %s634_s18, %s634_s18 }
   0xd   :  { %p641_p6 = por %p640_p5, %p639_p4 }
   0xf   :  { %p642_p7 = pnand %p641_p6, %p635_p3 }
  0x11   :  { %645 = shalt.err (!%p642_p7)
}
  0x12   :  { %s743_s19 = smov 64   ;;  %s744_s20 = smov 4  }
  0x13   :  { %39 = dma.hbm_to_vmem [thread:$0]  %s916_s1, 1024, %s34_s10, [#allocation6], %s743_s19, %s743_s19, %s744_s20  }
  0x14   :  { %s745_s23 = smov [#allocation2]   ;;  %s746_s25 = smov [#allocation7]  }
  0x15   :  { %s24_s24 = sshll.u32 %s745_s23, 4  ;;  %s47_s26 = sshll.u32 %s746_s25, 4  ;;  %s25_s24 = int_to_ptr.vmem [resolvable:$true] %s24_s24  ;;  %s48_s26 = int_to_ptr.vmem [resolvable:$true] %s47_s26 }
  0x16   :  { %s646_s29 = scalar_lea.hbm %s915_s0, 128 }
  0x17   :  { %p647_p8 = scmp.ne.s32.totalorder %s915_s0, %s646_s29  ;;  %p650_p9 = scmp.lt.u32.totalorder %s646_s29, %s915_s0 }
  0x19   :  { %p652_p10 = pnand %p650_p9, %p647_p8 }
  0x1b   :  { %655 = shalt.err (!%p652_p10)
}
  0x1c   :  { %s656_s1 = scalar_lea.vmem %s25_s24, 128  ;;  %p661_p12 = scmp.lt.s32.totalorder %s25_s24, %s25_s24 }
  0x1d   :  { %p657_p11 = scmp.ne.s32.totalorder %s25_s24, %s656_s1  ;;  %p662_p13 = scmp.lt.s32.totalorder %s656_s1, %s656_s1 }
  0x1f   :  { %p663_p0 = por %p662_p13, %p661_p12 }
  0x21   :  { %p664_p1 = pnand %p663_p0, %p657_p11 }
  0x23   :  { %667 = shalt.err (!%p664_p1)
}
  0x24   :  { %27 = dma.hbm_to_vmem [thread:$0]  %s915_s0, 128, %s25_s24, [#allocation3]  }
  0x25   :  { %s668_s17 = scalar_lea.hbm %s918_s3, 1024 }
  0x26   :  { %p669_p2 = scmp.ne.s32.totalorder %s918_s3, %s668_s17  ;;  %p672_p3 = scmp.lt.u32.totalorder %s668_s17, %s918_s3 }
  0x28   :  { %p674_p4 = pnand %p672_p3, %p669_p2 }
  0x2a   :  { %677 = shalt.err (!%p674_p4)
}
  0x2b   :  { %s678_s25 = scalar_lea.vmem %s48_s26, 1024  ;;  %p683_p6 = scmp.lt.s32.totalorder %s48_s26, %s48_s26 }
  0x2c   :  { %p679_p5 = scmp.ne.s32.totalorder %s48_s26, %s678_s25  ;;  %p684_p7 = scmp.lt.s32.totalorder %s678_s25, %s678_s25 }
  0x2e   :  { %p685_p8 = por %p684_p7, %p683_p6 }
  0x30   :  { %p686_p9 = pnand %p685_p8, %p679_p5 }
  0x32   :  { %689 = shalt.err (!%p686_p9)
}
  0x33   :  { %53 = dma.hbm_to_vmem [thread:$0]  %s918_s3, 1024, %s48_s26, [#allocation6], %s743_s19, %s743_s19, %s744_s20  }
  0x34   :  { %s747_s27 = smov [#allocation8]   ;;  %s690_s11 = scalar_lea.hbm %s920_s5, 1024 }
  0x35   :  { %s61_s28 = sshll.u32 %s747_s27, 4  ;;  %p691_p10 = scmp.ne.s32.totalorder %s920_s5, %s690_s11  ;;  %s62_s28 = int_to_ptr.vmem [resolvable:$true] %s61_s28 }
  0x36   :  { %p694_p11 = scmp.lt.u32.totalorder %s690_s11, %s920_s5 }
  0x38   :  { %p696_p12 = pnand %p694_p11, %p691_p10 }
  0x3a   :  { %699 = shalt.err (!%p696_p12)
}
  0x3b   :  { %s700_s14 = scalar_lea.vmem %s62_s28, 1024  ;;  %p705_p0 = scmp.lt.s32.totalorder %s62_s28, %s62_s28 }
  0x3c   :  { %p701_p13 = scmp.ne.s32.totalorder %s62_s28, %s700_s14  ;;  %p706_p1 = scmp.lt.s32.totalorder %s700_s14, %s700_s14 }
  0x3e   :  { %p707_p2 = por %p706_p1, %p705_p0 }
  0x40   :  { %p708_p3 = pnand %p707_p2, %p701_p13 }
  0x42   :  { %711 = shalt.err (!%p708_p3)
}
  0x43   :  { %67 = dma.hbm_to_vmem [thread:$0]  %s920_s5, 1024, %s62_s28, [#allocation9], %s743_s19, %s743_s19, %s744_s20  }
  0x44   :  { %734 = dma.done.wait [#allocation3], 128  }
  0x45   :  { %735 = vsyncadd [#allocation3], 4294967168 }
  0x46   :  { %736 = dma.done.wait [#allocation6], 2048  }
  0x47   :  { %737 = vsyncadd [#allocation6], 4294965248 }
  0x48   :  { %738 = dma.done.wait [#allocation9], 1024  }
  0x49   :  { %739 = vsyncadd [#allocation9], 4294966272  ;;  %v748_v0 = vmov 0.0   ;;  %vm749_vm0 = vmmov 0   ;;  %v598_v1 = vld [vmem:[#allocation5] sm:$0xff]   ;;  %v599_v2 = vld [vmem:[#allocation5 + $0x8] sm:$0xff]  }
  0x4a   :  { %529 = vmatprep.subr.bf16.mxu0 %v748_v0  ;;  %545 = vmatprep.mubr.msk.bf16.mxu0 %vm749_vm0, %v748_v0  ;;  %v600_v3 = vld [vmem:[#allocation5 + $0x10] sm:$0xff]   ;;  %v606_v4 = vld [vmem:[#allocation7] sm:$0xff]   ;;  %v601_v5 = vld [vmem:[#allocation5 + $0x18] sm:$0xff]   ;;  %s750_s22 = smov [#allocation10]  }
  0x4b   :  { %549 = vmatprep.subr.bf16.mxu1 %v748_v0  ;;  %565 = vmatprep.mubr.msk.bf16.mxu1 %vm749_vm0, %v748_v0  ;;  %v607_v6 = vld [vmem:[#allocation7 + $0x8] sm:$0xff]   ;;  %v602_v7 = vld [vmem:[#allocation5 + $0x20] sm:$0xff]   ;;  %v608_v8 = vld [vmem:[#allocation7 + $0x10] sm:$0xff]   ;;  %s462_s23 = sshll.u32 %s750_s22, 4  ;;  %s463_s23 = int_to_ptr.vmem [resolvable:$true] %s462_s23 }
  0x4c   :  { %530 = vmatpush3.bf16.msra.mxu0 %v598_v1  ;;  %550 = vmatpush3.bf16.msra.mxu1 %v606_v4  ;;  %v603_v9 = vld [vmem:[#allocation5 + $0x28] sm:$0xff]   ;;  %v609_v10 = vld [vmem:[#allocation7 + $0x18] sm:$0xff]   ;;  %v604_v11 = vld [vmem:[#allocation5 + $0x30] sm:$0xff]   ;;  %p717_p5 = scmp.lt.s32.totalorder %s463_s23, %s463_s23 }
  0x4d   :  { %531 = vmatprep.subr.bf16.mxu0 %v748_v0  ;;  %551 = vmatprep.subr.bf16.mxu1 %v748_v0  ;;  %v610_v12 = vld [vmem:[#allocation7 + $0x20] sm:$0xff]   ;;  %v605_v13 = vld [vmem:[#allocation5 + $0x38] sm:$0xff]   ;;  %v611_v15 = vld [vmem:[#allocation7 + $0x28] sm:$0xff]  }
  0x4e   :  { %v87_v14 = vld [vmem:[#allocation2] sm:$0xff]  ;;  %v612_v17 = vld [vmem:[#allocation7 + $0x30] sm:$0xff]   ;;  %v614_v27 = vld [vmem:[#allocation8] sm:$0xff]  }
  0x4f   :  { %v88_v16 = vpack.c.bf16 %v87_v14, %v87_v14  ;;  %v613_v18 = vld [vmem:[#allocation7 + $0x38] sm:$0xff]   ;;  %v615_v36 = vld [vmem:[#allocation8 + $0x8] sm:$0xff]   ;;  %v616_v37 = vld [vmem:[#allocation8 + $0x10] sm:$0xff]  }
  0x50   :  { %532 = vmatpush3.bf16.msra.mxu0 %v599_v2  ;;  %552 = vmatpush3.bf16.msra.mxu1 %v607_v6  ;;  %v473_v19 = vld [vmem:[%s917_s2] ss:$0 sm:$0xff]  ;;  %v618_v39 = vld [vmem:[#allocation8 + $0x20] sm:$0xff]   ;;  %v619_v40 = vld [vmem:[#allocation8 + $0x28] sm:$0xff]  }
  0x51   :  { %533 = vmatprep.subr.bf16.mxu0 %v748_v0  ;;  %553 = vmatprep.subr.bf16.mxu1 %v748_v0  ;;  %v482_v28 = vld [vmem:[%s919_s4] ss:$0 sm:$0xff]  ;;  %v620_v41 = vld [vmem:[#allocation8 + $0x30] sm:$0xff]  }
  0x52   :  { %v617_v38 = vld [vmem:[#allocation8 + $0x18] sm:$0xff]  }
  0x53   :  { %v621_v42 = vld [vmem:[#allocation8 + $0x38] sm:$0xff]  }
  0x54   :  { %534 = vmatpush3.bf16.msra.mxu0 %v600_v3  ;;  %554 = vmatpush3.bf16.msra.mxu1 %v608_v8  ;;  %v491_v52 = vld [vmem:[%s922_s7] ss:$0 sm:$0xff]  ;;  %s712_s7 = scalar_lea.vmem %s463_s23, 128 }
  0x55   :  { %535 = vmatprep.subr.bf16.mxu0 %v748_v0  ;;  %555 = vmatprep.subr.bf16.mxu1 %v748_v0  ;;  %v492_v54 = vld [vmem:[%s923_s8] ss:$0 sm:$0xff]  ;;  %p713_p4 = scmp.ne.s32.totalorder %s463_s23, %s712_s7  ;;  %p718_p6 = scmp.lt.s32.totalorder %s712_s7, %s712_s7 }
  0x56   :  { %v493_v58 = vld [vmem:[%s921_s6] ss:$0 sm:$0xff] }
  0x57   :  { %p719_p7 = por %p718_p6, %p717_p5 }
  0x58   :  { %536 = vmatpush3.bf16.msra.mxu0 %v601_v5  ;;  %556 = vmatpush3.bf16.msra.mxu1 %v609_v10 }
  0x59   :  { %537 = vmatprep.subr.bf16.mxu0 %v748_v0  ;;  %557 = vmatprep.subr.bf16.mxu1 %v748_v0  ;;  %p720_p8 = pnand %p719_p7, %p713_p4 }
  0x5c   :  { %538 = vmatpush3.bf16.msra.mxu0 %v602_v7  ;;  %558 = vmatpush3.bf16.msra.mxu1 %v610_v12 }
  0x5d   :  { %539 = vmatprep.subr.bf16.mxu0 %v748_v0  ;;  %559 = vmatprep.subr.bf16.mxu1 %v748_v0 }
  0x60   :  { %540 = vmatpush3.bf16.msra.mxu0 %v603_v9  ;;  %560 = vmatpush3.bf16.msra.mxu1 %v611_v15 }
  0x61   :  { %541 = vmatprep.subr.bf16.mxu0 %v748_v0  ;;  %561 = vmatprep.subr.bf16.mxu1 %v748_v0 }
  0x64   :  { %542 = vmatpush3.bf16.msra.mxu0 %v604_v11  ;;  %562 = vmatpush3.bf16.msra.mxu1 %v612_v17 }
  0x65   :  { %543 = vmatprep.subr.bf16.mxu0 %v748_v0  ;;  %563 = vmatprep.subr.bf16.mxu1 %v748_v0 }
  0x68   :  { %544 = vmatpush3.bf16.msra.mxu0 %v605_v13  ;;  %564 = vmatpush3.bf16.msra.mxu1 %v613_v18 }
  0x69   :  { %569 = vmatprep.subr.bf16.mxu0 %v748_v0 }
  0x6b   :  { %546 = vmatmul.mubr.bf16.vlgmr.msra.gmra.mrb[0].mxu0 %v88_v16 }
  0x6c   :  { %585 = vmatprep.mubr.msk.bf16.mxu0 %vm749_vm0, %v748_v0  ;;  %570 = vmatpush3.bf16.msra.mxu0 %v614_v27 }
  0x6d   :  { %571 = vmatprep.subr.bf16.mxu0 %v748_v0 }
  0x70   :  { %572 = vmatpush3.bf16.msra.mxu0 %v615_v36 }
  0x71   :  { %573 = vmatprep.subr.bf16.mxu0 %v748_v0 }
  0x74   :  { %574 = vmatpush3.bf16.msra.mxu0 %v616_v37 }
  0x75   :  { %575 = vmatprep.subr.bf16.mxu0 %v748_v0 }
  0x78   :  { %576 = vmatpush3.bf16.msra.mxu0 %v617_v38 }
  0x79   :  { %577 = vmatprep.subr.bf16.mxu0 %v748_v0 }
  0x7c   :  { %578 = vmatpush3.bf16.msra.mxu0 %v618_v39 }
  0x7d   :  { %579 = vmatprep.subr.bf16.mxu0 %v748_v0 }
  0x80   :  { %580 = vmatpush3.bf16.msra.mxu0 %v619_v40 }
  0x81   :  { %581 = vmatprep.subr.bf16.mxu0 %v748_v0 }
  0x84   :  { %582 = vmatpush3.bf16.msra.mxu0 %v620_v41 }
  0x85   :  { %583 = vmatprep.subr.bf16.mxu0 %v748_v0 }
  0x88   :  { %584 = vmatpush3.bf16.msra.mxu0 %v621_v42 }
 0x13e   :  { %v194_v20 = vpop.f32.mrb[0].mxu0 }
 0x13f   :  { %v195_v21 = vadd.f32 %v473_v19, %v194_v20  ;;  %v547_v22 = vpop.f32.mrb[1].mxu0 }
 0x140   :  { %v197_v23 = vpop.f32.mrb[2].mxu0 }
 0x141   :  { %v200_v24 = vmax.f32 %v195_v21, 0.0  ;;  %v548_v25 = vpop.f32.mrb[3].mxu0 }
 0x143   :  { %v201_v26 = vpack.c.bf16 %v200_v24, %v200_v24 }
 0x145   :  { %566 = vmatmul.mubr.bf16.vlgmr.msra.gmra.mrb[0].mxu1 %v201_v26 }
 0x218   :  { %v307_v29 = vpop.f32.mrb[0].mxu1 }
 0x219   :  { %v308_v30 = vadd.f32 %v482_v28, %v307_v29  ;;  %v567_v31 = vpop.f32.mrb[1].mxu1 }
 0x21a   :  { %v310_v32 = vpop.f32.mrb[2].mxu1 }
 0x21b   :  { %v313_v33 = vmax.f32 %v308_v30, 0.0  ;;  %v568_v34 = vpop.f32.mrb[3].mxu1 }
 0x21d   :  { %314 = vadd.xlane.f32.xlu0 %v313_v33  ;;  %v317_v35 = vmul.f32 %v313_v33, %v313_v33 }
 0x221   :  { %318 = vadd.xlane.f32.xlu0 %v317_v35 }
 0x2aa   :  { %v315_v43 = vpop.xlane.xlu0 %314 }
 0x2ab   :  { %v316_v44 = vmul.f32 0.03125, %v315_v43 }
 0x2ad   :  { %v321_v46 = vmul.f32 %v316_v44, %v316_v44  ;;  %v323_v50 = vsub.f32 %v313_v33, %v316_v44 }
 0x2ae   :  { %v319_v45 = vpop.xlane.xlu0 %318 }
 0x2af   :  { %v320_v47 = vmul.f32 0.03125, %v319_v45 }
 0x2b1   :  { %v322_v48 = vsub.f32 %v320_v47, %v321_v46 }
 0x2b3   :  { %v324_v49 = vadd.f32 1e-05, %v322_v48 }
 0x2b5   :  { %622 = vrsqrt.f32 %v324_v49 }
 0x2bf   :  { %v623_v51 = vpop.eup %622 }
 0x2c0   :  { %v326_v53 = vmul.f32 %v623_v51, %v323_v50 }
 0x2c2   :  { %v334_v55 = vmul.f32 %v491_v52, %v326_v53 }
 0x2c4   :  { %v342_v56 = vadd.f32 %v492_v54, %v334_v55 }
 0x2c6   :  { %v343_v57 = vpack.c.bf16 %v342_v56, %v342_v56 }
 0x2c8   :  { %586 = vmatmul.mubr.bf16.vlgmr.msra.gmra.mrb[4].mxu0 %v343_v57 }
 0x39b   :  { %v449_v59 = vpop.f32.mrb[4].mxu0 }
 0x39c   :  { %v450_v60 = vadd.f32 %v493_v58, %v449_v59  ;;  %v587_v61 = vpop.f32.mrb[5].mxu0 }
 0x39d   :  { %v452_v62 = vpop.f32.mrb[6].mxu0 }
 0x39e   :  { %455 = vst [vmem:[#allocation10] sm:$0xff] %v450_v60  ;;  %v588_v63 = vpop.f32.mrb[7].mxu0 }
 0x39f   :  { %723 = shalt.err (!%p720_p8)
}
 0x3a0   :  { %s724_s6 = scalar_lea.hbm %s924_s9, 128 }
 0x3a1   :  { %p725_p9 = scmp.ne.s32.totalorder %s924_s9, %s724_s6  ;;  %p728_p10 = scmp.lt.u32.totalorder %s724_s6, %s924_s9 }
 0x3a3   :  { %p730_p11 = pnand %p728_p10, %p725_p9 }
 0x3a5   :  { %733 = shalt.err (!%p730_p11)
}
 0x3a6   :  { %465 = dma.vmem_to_hbm [thread:$0]  %s463_s23, 128, %s924_s9, [#allocation4]  }
 0x3a7   :  { %740 = dma.done.wait [#allocation4], 128  }
 0x3a8   :  { %741 = vsyncadd [#allocation4], 4294967168 }
 0x3a9   :  { %469 = vsyncpa [#allocation3], 1 }
 0x3aa   :  { %470 = vsyncpa [#allocation6], 1 }
 0x3ab   :  { %471 = vsyncpa [#allocation9], 1 }
 0x3ac   :  { %472 = vsyncpa [#allocation4], 1 }

</bundles_post_ra>
